<compile_context>
chip_gen: v5e
topology: v5e:2x2
jax: 0.10.0
libtpu: 0.0.40
codegen_flags: <defaults>
</compile_context>

<pallas_src>
import functools

import jax
import jax.numpy as jnp
from jax.experimental import pallas as pl
from jax.experimental.pallas import tpu as pltpu


def _round_up(n, m):
    return (n + m - 1) // m * m


def _branching_kernel(xT_ref, w1t_ref, w2_ref, out_ref, *, num_context, hidden):
    """One row-tile of BranchingLayer in transposed (feature-major) layout.

    xT_ref:  (H, TN)    f32/bf16   input rows, transposed
    w1t_ref: (C*H, H)   f32/bf16   gate1 (per-context transposed + stacked)
    w2_ref:  (C, H)     f32        gate2 (trailing singleton dim squeezed)
    out_ref: (C, TN)    f32        softmax weights over contexts (transposed)
    """
    # Single fused MXU matmul: (C*H, H) @ (H, TN) -> (C*H, TN), f32 accumulate.
    hT = jnp.tanh(
        jnp.dot(w1t_ref[...], xT_ref[...], preferred_element_type=jnp.float32)
    )
    tn = hT.shape[-1]

    # Second "matmul" (output width 1 per context) as VPU multiply + reduce
    # over H. Lane (minor) dim stays TN and H is a multiple of 8, so the
    # sublane-splitting reshape is relayout-free.
    h3 = hT.reshape(num_context, hidden, tn)                  # (C, H, TN)
    logits = jnp.sum(h3 * w2_ref[...][:, :, None], axis=1)    # (C, TN)

    # Numerically stable softmax over the context axis (axis 0 here).
    m = jnp.max(logits, axis=0, keepdims=True)
    e = jnp.exp(logits - m)
    denom = jnp.sum(e, axis=0, keepdims=True)
    out_ref[...] = e * pl.reciprocal(denom, approx=False)


def branching_layer(seqs, timeline_mask, gate1, gate2, *, row_tile=256,
                    matmul_dtype=jnp.float32):
    """JAX/Pallas equivalent of BranchingLayer.forward.

    seqs:          (B, T, H) float32
    timeline_mask: (B, T)    bool   (True -> zero the weights at that position)
    gate1:         (C, H, H) float32
    gate2:         (C, H, 1) float32
    returns:       (B, T, C) float32
    """
    B, T, H = seqs.shape
    C = gate1.shape[0]
    N = B * T

    # Lane-dense row tiles: >=128 rows per grid step, pad N up as needed
    # (tiny inputs clamp to a single 128-wide tile).
    tile = min(row_tile, _round_up(N, 128))
    tile = _round_up(tile, 128)
    n_pad = _round_up(N, tile)

    # Transposed, padded input: (H, N_pad). Padded columns are zero -> uniform
    # softmax weights there; they are sliced away below.
    x = seqs.reshape(N, H)
    if n_pad != N:
        x = jnp.pad(x, ((0, n_pad - N), (0, 0)))
    xT = x.T.astype(matmul_dtype)                                   # (H, N_pad)

    # gate1 -> (C*H, H): row c*H + j, col k holds gate1[c, k, j].
    w1t = jnp.transpose(gate1, (0, 2, 1)).reshape(C * H, H).astype(matmul_dtype)
    w2 = gate2.reshape(C, H).astype(jnp.float32)

    grid = (n_pad // tile,)
    kernel = functools.partial(_branching_kernel, num_context=C, hidden=H)

    # NOTE(v7x): for large C/H, give the constant-index weight specs
    # pipeline_mode=pl.Buffered(1) and set vmem_limit_bytes explicitly so the
    # resident gates are not double-buffered against the 64 MiB VMEM.
    out_t = pl.pallas_call(
        kernel,
        out_shape=jax.ShapeDtypeStruct((C, n_pad), jnp.float32),
        grid_spec=pltpu.PrefetchScalarGridSpec(
            num_scalar_prefetch=0,
            grid=grid,
            in_specs=[
                pl.BlockSpec((H, tile), lambda i: (0, i)),        # xT row-tile
                pl.BlockSpec((C * H, H), lambda i: (0, 0)),       # gate1 (resident)
                pl.BlockSpec((C, H), lambda i: (0, 0)),           # gate2 (resident)
            ],
            out_specs=pl.BlockSpec((C, tile), lambda i: (0, i)),  # lane-dense out
        ),
        compiler_params=pltpu.CompilerParams(
            dimension_semantics=("parallel",),
        ),
    )(xT, w1t, w2)

    weights = out_t[:, :N].T.reshape(B, T, C)
    # masked_fill(timeline_mask.unsqueeze(-1), 0.0) — done in the wrapper so the
    # kernel avoids a lane-width-1 mask DMA; XLA fuses it with the slice above.
    return jnp.where(timeline_mask[..., None], 0.0, weights)


def _reference(seqs, timeline_mask, gate1, gate2, matmul_dtype=jnp.float32):
    """Pure-JAX reference mirroring the PyTorch forward. Inputs to the first
    matmul get the same dtype the kernel uses; accumulation, tanh and softmax
    run in f32."""
    B, T, H = seqs.shape
    C = gate1.shape[0]
    prec = jax.lax.Precision.HIGHEST if matmul_dtype == jnp.float32 else None
    x = seqs.reshape(-1, H).astype(matmul_dtype)
    logits = []
    for i in range(C):
        h = jnp.tanh(jnp.dot(x, gate1[i].astype(matmul_dtype),
                             preferred_element_type=jnp.float32,
                             precision=prec))                             # (N, H)
        logits.append(jnp.dot(h, gate2[i].astype(jnp.float32),
                              preferred_element_type=jnp.float32,
                              precision=prec)[:, 0])                      # (N,)
    logits = jnp.stack(logits, axis=-1).reshape(B, T, C)
    m = jnp.max(logits, axis=-1, keepdims=True)
    e = jnp.exp(logits - m)
    w = e / jnp.sum(e, axis=-1, keepdims=True)
    return jnp.where(timeline_mask[..., None], 0.0, w)


if __name__ == "__main__":
    # Shapes implied by the module: B=2, T=8 (seq), H=32 (hidden_units),
    # C=4 (num_context).
    B, T, H, C = 2, 8, 32, 4

    key = jax.random.PRNGKey(0)
    k_seq, k_g1, k_g2, k_mask = jax.random.split(key, 4)

    seqs = jax.random.normal(k_seq, (B, T, H), dtype=jnp.float32)
    gate1 = jax.random.normal(k_g1, (C, H, H), dtype=jnp.float32)
    gate2 = jax.random.normal(k_g2, (C, H, 1), dtype=jnp.float32)
    # timeline_mask: True marks padded positions whose weights become 0.
    timeline_mask = jax.random.bernoulli(k_mask, p=0.25, shape=(B, T))

    fn = jax.jit(branching_layer)
    out = fn(seqs, timeline_mask, gate1, gate2)
    out = jax.block_until_ready(out)

    ref = _reference(seqs, timeline_mask, gate1, gate2)
    assert out.shape == (B, T, C)
    # Generous tolerance absorbs any MXU bf16-pass rounding of the f32 matmul;
    # outputs are softmax weights in [0, 1].
    assert jnp.allclose(out, ref, atol=5e-3, rtol=5e-3), "mismatch vs reference"
    # Masked positions must be exactly zero.
    assert bool(jnp.all(jnp.where(timeline_mask[..., None], out == 0.0, True)))

    print("KERNEL_OK")
</pallas_src>

<mosaic_0001>
module attributes {stable_mosaic.version = 11 : i64} {
  func.func @_branching_kernel(%arg0: i32, %arg1: memref<32x128xf32, #tpu.memory_space<vmem>>, %arg2: memref<128x32xf32, #tpu.memory_space<vmem>>, %arg3: memref<4x32xf32, #tpu.memory_space<vmem>>, %arg4: memref<4x128xf32, #tpu.memory_space<vmem>>) attributes {dimension_semantics = [#tpu.dimension_semantics<parallel>], iteration_bounds = array<i64: 1>, scalar_prefetch = 0 : i64, scratch_operands = 0 : i64, tpu.core_type = #tpu.core_type<tc>, window_params = [{transform_indices = @transform_0, window_bounds = array<i64: 32, 128>}, {pipeline_mode = #tpu.pipeline_mode<synchronous>, transform_indices = @transform_1, window_bounds = array<i64: 128, 32>}, {pipeline_mode = #tpu.pipeline_mode<synchronous>, transform_indices = @transform_2, window_bounds = array<i64: 4, 32>}, {transform_indices = @transform_3, window_bounds = array<i64: 4, 128>}]} {
    %c0 = arith.constant 0 : index
    %c0_0 = arith.constant 0 : index
    %0 = vector.load %arg2[%c0, %c0_0] : memref<128x32xf32, #tpu.memory_space<vmem>>, vector<128x32xf32>
    %c0_1 = arith.constant 0 : index
    %c0_2 = arith.constant 0 : index
    %1 = vector.load %arg1[%c0_1, %c0_2] : memref<32x128xf32, #tpu.memory_space<vmem>>, vector<32x128xf32>
    %cst = arith.constant dense<0.000000e+00> : vector<128x128xf32>
    %2 = tpu.matmul %0, %1, %cst {dimension_numbers = #tpu.dot_dimension_numbers<[1], [0], [0], [1], [0, 0, 1, 1], [], []>} : vector<128x32xf32>, vector<32x128xf32>, vector<128x128xf32> -> vector<128x128xf32>
    %3 = math.tanh %2 : vector<128x128xf32>
    %4 = vector.shape_cast %3 : vector<128x128xf32> to vector<4x32x128xf32>
    %c0_3 = arith.constant 0 : index
    %c0_4 = arith.constant 0 : index
    %5 = vector.load %arg3[%c0_3, %c0_4] : memref<4x32xf32, #tpu.memory_space<vmem>>, vector<4x32xf32>
    %6 = vector.shape_cast %5 : vector<4x32xf32> to vector<4x32x1xf32>
    %7 = vector.broadcast %6 : vector<4x32x1xf32> to vector<4x32x128xf32>
    %8 = arith.mulf %4, %7 : vector<4x32x128xf32>
    %cst_5 = arith.constant dense<0.000000e+00> : vector<4x128xf32>
    %9 = vector.multi_reduction <add>, %8, %cst_5 [1] : vector<4x32x128xf32> to vector<4x128xf32>
    %cst_6 = arith.constant dense<0xFF800000> : vector<128xf32>
    %10 = vector.multi_reduction <maximumf>, %9, %cst_6 [0] : vector<4x128xf32> to vector<128xf32>
    %11 = vector.shape_cast %10 : vector<128xf32> to vector<1x128xf32>
    %12 = vector.broadcast %11 : vector<1x128xf32> to vector<4x128xf32>
    %13 = arith.subf %9, %12 : vector<4x128xf32>
    %14 = math.exp %13 : vector<4x128xf32>
    %cst_7 = arith.constant dense<0.000000e+00> : vector<128xf32>
    %15 = vector.multi_reduction <add>, %14, %cst_7 [0] : vector<4x128xf32> to vector<128xf32>
    %16 = vector.shape_cast %15 : vector<128xf32> to vector<1x128xf32>
    %17 = tpu.reciprocal %16 : vector<1x128xf32> -> vector<1x128xf32>
    %18 = vector.broadcast %17 : vector<1x128xf32> to vector<4x128xf32>
    %19 = arith.mulf %14, %18 : vector<4x128xf32>
    %c0_8 = arith.constant 0 : index
    %c0_9 = arith.constant 0 : index
    %20 = vector.load %arg4[%c0_8, %c0_9] : memref<4x128xf32, #tpu.memory_space<vmem>>, vector<4x128xf32>
    tpu.vector_store %arg4[%c0_8, %c0_9], %19 {strides = array<i32>} : memref<4x128xf32, #tpu.memory_space<vmem>>, vector<4x128xf32>,
    return
  }
  func.func @transform_0(%arg0: i32) -> (i32, i32) {
    %c0_i32 = arith.constant 0 : i32
    %c0_i32_0 = arith.constant 0 : i32
    return %c0_i32, %arg0 : i32, i32
  }
  func.func @transform_1(%arg0: i32) -> (i32, i32) {
    %c0_i32 = arith.constant 0 : i32
    %c0_i32_0 = arith.constant 0 : i32
    %c0_i32_1 = arith.constant 0 : i32
    return %c0_i32, %c0_i32_0 : i32, i32
  }
  func.func @transform_2(%arg0: i32) -> (i32, i32) {
    %c0_i32 = arith.constant 0 : i32
    %c0_i32_0 = arith.constant 0 : i32
    %c0_i32_1 = arith.constant 0 : i32
    return %c0_i32, %c0_i32_0 : i32, i32
  }
  func.func @transform_3(%arg0: i32) -> (i32, i32) {
    %c0_i32 = arith.constant 0 : i32
    %c0_i32_0 = arith.constant 0 : i32
    return %c0_i32, %arg0 : i32, i32
  }
}

</mosaic_0001>

<bundles_post_ra>
// kernel: branching_layer.1
= control target key start
LH: loop header
LB: loop body
LE: loop exit
PB: predicated region body
PF: predicated region fallthrough
CT: control target
= control target key end

     0   :  { %v166_v0 = vlaneseq  ;;  %vm34_vm0 = vcmask 261120   ;;  %vm337_vm1 = vcmask 1041409   ;;  %vm340_vm2 = vcmask 1042434   ;;  %s598_s0 = inlined_call_operand.vmem [shape: f32[32,128], index: 0, kind: input, shape index: {}]   ;;  %s599_s2 = inlined_call_operand.vmem [shape: f32[4,32], index: 2, kind: input, shape index: {}]   ;;  %s600_s1 = inlined_call_operand.vmem [shape: f32[128,32], index: 1, kind: input, shape index: {}]   ;;  %s601_s3 = inlined_call_operand.vmem [shape: f32[4,128], index: 3, kind: output, shape index: {}]  }
   0x1   :  { %v33_v1 = vld [vmem:[%s598_s0 + $0x18] sm:$0xff]  ;;  %v32_v3 = vld [vmem:[%s598_s0 + $0x10] sm:$0xff]  ;;  %v31_v4 = vld [vmem:[%s598_s0 + $0x8] sm:$0xff]  ;;  %vm343_vm3 = vcmask 1043459   ;;  %vm346_vm4 = vcmask 1043456  }
   0x2   :  { %95 = vmatpush.msra.mxu0 %v33_v1  ;;  %405 = vmatpush.msra.mxu1 %v33_v1  ;;  %v495_v2 = vshrl.u32 %v166_v0, 7  ;;  %v30_v5 = vld [vmem:[%s598_s0] sm:$0xff]  ;;  %v15_v13 = vld [vmem:[%s600_s1 + $0x8] sm:$0xff]  ;;  %v16_v19 = vld [vmem:[%s600_s1 + $0x10] sm:$0xff] }
   0x3   :  { %406 = vmatpush.msra.mxu2 %v33_v1  ;;  %407 = vmatpush.msra.mxu3 %v33_v1  ;;  %v164_v6 = vld [vmem:[%s599_s2] sm:$0xf]  ;;  %v19_v14 = vld [vmem:[%s600_s1 + $0x28] sm:$0xff]  ;;  %v20_v20 = vld [vmem:[%s600_s1 + $0x30] sm:$0xff] }
   0x4   :  { %419 = vset.pattern.permute.xlu1 %v495_v2  ;;  %417 = vset.pattern.permute.xlu0 %v495_v2  ;;  %v14_v7 = vld [vmem:[%s600_s1] sm:$0xff]  ;;  %v190_v11 = vperm.slane %v164_v6, 1  ;;  %v165_v12 = vperm.slane %v164_v6, 0  ;;  %v23_v15 = vld [vmem:[%s600_s1 + $0x48] sm:$0xff]  ;;  %v215_v17 = vperm.slane %v164_v6, 2  ;;  %v174_v18 = vadd.s32 8, %v495_v2 }
   0x5   :  { %96 = vmatpush.msra.mxu0 %v32_v3  ;;  %408 = vmatpush.msra.mxu1 %v32_v3  ;;  %v18_v8 = vld [vmem:[%s600_s1 + $0x20] sm:$0xff]  ;;  %v27_v16 = vld [vmem:[%s600_s1 + $0x68] sm:$0xff]  ;;  %v24_v21 = vld [vmem:[%s600_s1 + $0x50] sm:$0xff]  ;;  %v180_v27 = vadd.s32 16, %v495_v2  ;;  %v240_v28 = vperm.slane %v164_v6, 3  ;;  %v186_v29 = vadd.s32 24, %v495_v2 }
   0x6   :  { %409 = vmatpush.msra.mxu2 %v32_v3  ;;  %410 = vmatpush.msra.mxu3 %v32_v3  ;;  %v22_v9 = vld [vmem:[%s600_s1 + $0x40] sm:$0xff]  ;;  %v28_v22 = vld [vmem:[%s600_s1 + $0x70] sm:$0xff]  ;;  %v17_v23 = vld [vmem:[%s600_s1 + $0x18] sm:$0xff] }
   0x7   :  { %97 = vmatpush.msra.mxu0 %v31_v4  ;;  %411 = vmatpush.msra.mxu1 %v31_v4  ;;  %v26_v10 = vld [vmem:[%s600_s1 + $0x60] sm:$0xff]  ;;  %v21_v24 = vld [vmem:[%s600_s1 + $0x38] sm:$0xff] }
   0x8   :  { %412 = vmatpush.msra.mxu2 %v31_v4  ;;  %413 = vmatpush.msra.mxu3 %v31_v4  ;;  %v29_v25 = vld [vmem:[%s600_s1 + $0x78] sm:$0xff] }
   0x9   :  { %98 = vmatpush.msra.mxu0 %v30_v5  ;;  %414 = vmatpush.msra.mxu1 %v30_v5  ;;  %v25_v26 = vld [vmem:[%s600_s1 + $0x58] sm:$0xff] }
   0xa   :  { %415 = vmatpush.msra.mxu2 %v30_v5  ;;  %416 = vmatpush.msra.mxu3 %v30_v5 }
   0xb   :  { %389 = vmatmul.msk.f32.vlgmr.msra.gmra.mxu0 %vm34_vm0, %v14_v7  ;;  %393 = vmatmul.msk.f32.vlgmr.msra.gmra.mxu1 %vm34_vm0, %v18_v8 }
   0xc   :  { %397 = vmatmul.msk.f32.vlgmr.msra.gmra.mxu2 %vm34_vm0, %v22_v9  ;;  %401 = vmatmul.msk.f32.vlgmr.msra.gmra.mxu3 %vm34_vm0, %v26_v10 }
   0xd   :  { %420 = vset.pattern.permute.xlu2 %v495_v2  ;;  %195 = vperm.xlu1 %419, %v190_v11  }
   0xe   :  { %170 = vperm.xlu0 %417, %v165_v12  }
  0x13   :  { %390 = vmatmul.msk.f32.gmra.mxu0 %vm34_vm0, %v15_v13  ;;  %394 = vmatmul.msk.f32.gmra.mxu1 %vm34_vm0, %v19_v14 }
  0x14   :  { %398 = vmatmul.msk.f32.gmra.mxu2 %vm34_vm0, %v23_v15  ;;  %402 = vmatmul.msk.f32.gmra.mxu3 %vm34_vm0, %v27_v16 }
  0x15   :  { %220 = vperm.xlu2 %420, %v215_v17   ;;  %421 = vset.pattern.permute.xlu1 %v174_v18 }
  0x16   :  { %418 = vset.pattern.permute.xlu0 %v174_v18 }
  0x1b   :  { %391 = vmatmul.msk.f32.gmra.mxu0 %vm34_vm0, %v16_v19  ;;  %395 = vmatmul.msk.f32.gmra.mxu1 %vm34_vm0, %v20_v20 }
  0x1c   :  { %399 = vmatmul.msk.f32.gmra.mxu2 %vm34_vm0, %v24_v21  ;;  %403 = vmatmul.msk.f32.gmra.mxu3 %vm34_vm0, %v28_v22 }
  0x1d   :  { %423 = vset.pattern.permute.xlu2 %v174_v18  ;;  %201 = vperm.xlu1 %421, %v190_v11  }
  0x1e   :  { %176 = vperm.xlu0 %418, %v165_v12  }
  0x23   :  { %392 = vmatmul.msk.f32.gmra.mxu0 %vm34_vm0, %v17_v23  ;;  %396 = vmatmul.msk.f32.gmra.mxu1 %vm34_vm0, %v21_v24 }
  0x24   :  { %404 = vmatmul.msk.f32.gmra.mxu3 %vm34_vm0, %v29_v25  ;;  %400 = vmatmul.msk.f32.gmra.mxu2 %vm34_vm0, %v25_v26 }
  0x25   :  { %226 = vperm.xlu2 %423, %v215_v17   ;;  %422 = vset.pattern.permute.xlu1 %v495_v2 }
  0x26   :  { %424 = vset.pattern.permute.xlu0 %v180_v27 }
  0x2d   :  { %251 = vperm.xlu2 %423, %v240_v28   ;;  %245 = vperm.xlu1 %422, %v240_v28  }
  0x2e   :  { %182 = vperm.xlu0 %424, %v165_v12  }
  0x35   :  { %426 = vset.pattern.permute.xlu2 %v180_v27  ;;  %425 = vset.pattern.permute.xlu1 %v180_v27 }
  0x36   :  { %428 = vset.pattern.permute.xlu0 %v186_v29 }
  0x3d   :  { %232 = vperm.xlu2 %426, %v215_v17   ;;  %207 = vperm.xlu1 %425, %v190_v11  }
  0x3e   :  { %213 = vperm.xlu0 %428, %v190_v11  }
  0x45   :  { %427 = vset.pattern.permute.xlu2 %v186_v29  ;;  %257 = vperm.xlu1 %425, %v240_v28  }
  0x4d   :  { %188 = vperm.xlu2 %427, %v165_v12   ;;  %429 = vset.pattern.permute.xlu1 %v186_v29 }
  0x55   :  { %238 = vperm.xlu1 %429, %v215_v17   ;;  %263 = vperm.xlu2 %427, %v240_v28  }
  0x6f   :  { %v580_v30 = vpop.permute.xlu2 %220 }
  0x7f   :  { %v582_v33 = vpop.permute.xlu2 %226  ;;  %v196_v35 = vpop.permute.xlu1 %195 }
  0x80   :  { %v171_v36 = vpop.permute.xlu0 %170 }
  0x87   :  { %v252_v39 = vpop.permute.xlu2 %251 }
  0x88   :  { %v100_v31 = vpop.f32.mrf.mxu0  ;;  %v112_v32 = vpop.f32.mrf.mxu1 }
  0x89   :  { %430 = vtanh.f32 %v100_v31 }
  0x8a   :  { %432 = vtanh.f32 %v112_v32 }
  0x8f   :  { %v136_v34 = vpop.f32.mrf.mxu3  ;;  %v202_v41 = vpop.permute.xlu1 %201 }
  0x90   :  { %v103_v37 = vpop.f32.mrf.mxu0  ;;  %v115_v38 = vpop.f32.mrf.mxu1  ;;  %434 = vtanh.f32 %v136_v34 }
  0x91   :  { %v124_v42 = vpop.f32.mrf.mxu2  ;;  %v177_v44 = vpop.permute.xlu0 %176  ;;  %436 = vtanh.f32 %v115_v38 }
  0x92   :  { %438 = vtanh.f32 %v103_v37  ;;  %v431_v51 = vpop.eup %430 }
  0x93   :  { %v433_v52 = vpop.eup %432  ;;  %v265_v9 = vmul.f32 %v431_v51, %v171_v36 }
  0x94   :  { %v269_v4 = vmul.f32 %v433_v52, %v196_v35 }
  0x96   :  { %v435_v55 = vpop.eup %434 }
  0x97   :  { %v139_v40 = vpop.f32.mrf.mxu3  ;;  %v584_v47 = vpop.permute.xlu2 %232 }
  0x98   :  { %v118_v43 = vpop.f32.mrf.mxu1  ;;  %v106_v45 = vpop.f32.mrf.mxu0 }
  0x99   :  { %v127_v49 = vpop.f32.mrf.mxu2  ;;  %440 = vtanh.f32 %v118_v43  ;;  %v437_v57 = vpop.eup %436 }
  0x9a   :  { %442 = vtanh.f32 %v139_v40  ;;  %v439_v60 = vpop.eup %438  ;;  %v270_v63 = vmul.f32 %v437_v57, %v202_v41 }
  0x9b   :  { %444 = vtanh.f32 %v106_v45  ;;  %v266_v11 = vmul.f32 %v439_v60, %v177_v44 }
  0x9c   :  { %v290_v12 = vadd.f32 %v270_v63, %v269_v4 }
  0x9d   :  { %v281_v21 = vadd.f32 %v266_v11, %v265_v9 }
  0x9f   :  { %v142_v46 = vpop.f32.mrf.mxu3  ;;  %v246_v48 = vpop.permute.xlu1 %245 }
  0xa0   :  { %v121_v50 = vpop.f32.mrf.mxu1  ;;  %v183_v53 = vpop.permute.xlu0 %182  ;;  %v277_v3 = vmul.f32 %v435_v55, %v246_v48 }
  0xa1   :  { %v109_v54 = vpop.f32.mrf.mxu0  ;;  %446 = vtanh.f32 %v121_v50  ;;  %v441_v61 = vpop.eup %440 }
  0xa2   :  { %448 = vtanh.f32 %v142_v46  ;;  %v443_v62 = vpop.eup %442  ;;  %v130_v2 = vpop.f32.mrf.mxu2 }
  0xa3   :  { %450 = vtanh.f32 %v109_v54  ;;  %v445_v0 = vpop.eup %444  ;;  %v278_v10 = vmul.f32 %v443_v62, %v252_v39 }
  0xa4   :  { %v267_v14 = vmul.f32 %v445_v0, %v183_v53 }
  0xa5   :  { %v308_v17 = vadd.f32 %v278_v10, %v277_v3 }
  0xa6   :  { %v282_v25 = vadd.f32 %v281_v21, %v267_v14 }
  0xa7   :  { %v145_v56 = vpop.f32.mrf.mxu3  ;;  %v189_v58 = vpop.permute.xlu2 %188 }
  0xa8   :  { %452 = vtanh.f32 %v145_v56  ;;  %v447_v1 = vpop.eup %446 }
  0xa9   :  { %v449_v6 = vpop.eup %448  ;;  %454 = vtanh.f32 %v124_v42 }
  0xaa   :  { %v451_v8 = vpop.eup %450  ;;  %456 = vtanh.f32 %v127_v49  ;;  %v133_v27 = vpop.f32.mrf.mxu2 }
  0xab   :  { %v268_v22 = vmul.f32 %v451_v8, %v189_v58  ;;  %458 = vtanh.f32 %v130_v2 }
  0xac   :  { %460 = vtanh.f32 %v133_v27 }
  0xad   :  { %v283_v29 = vadd.f32 %v282_v25, %v268_v22 }
  0xae   :  { %v453_v13 = vpop.eup %452 }
  0xaf   :  { %v208_v59 = vpop.permute.xlu1 %207  ;;  %v264_v16 = vpop.permute.xlu2 %263  ;;  %v284_v37 = vrot.slane %v283_v29, 4 }
  0xb0   :  { %v271_v5 = vmul.f32 %v441_v61, %v208_v59  ;;  %v214_v7 = vpop.permute.xlu0 %213  ;;  %v280_v24 = vmul.f32 %v453_v13, %v264_v16  ;;  %v455_v28 = vpop.eup %454 }
  0xb1   :  { %v272_v19 = vmul.f32 %v447_v1, %v214_v7  ;;  %v457_v32 = vpop.eup %456  ;;  %v273_v39 = vmul.f32 %v455_v28, %v580_v30  ;;  %v285_v44 = vadd.f32 %v284_v37, %v283_v29 }
  0xb2   :  { %v291_v18 = vadd.f32 %v290_v12, %v271_v5  ;;  %v459_v35 = vpop.eup %458  ;;  %v274_v36 = vmul.f32 %v457_v32, %v582_v33 }
  0xb3   :  { %v275_v40 = vmul.f32 %v459_v35, %v584_v47  ;;  %v461_v42 = vpop.eup %460  ;;  %v286_v51 = vrot.slane %v285_v44, 2 }
  0xb4   :  { %v292_v26 = vadd.f32 %v291_v18, %v272_v19  ;;  %v299_v43 = vadd.f32 %v274_v36, %v273_v39 }
  0xb5   :  { %v287_v55 = vadd.f32 %v286_v51, %v285_v44 }
  0xb6   :  { %v293_v34 = vrot.slane %v292_v26, 4  ;;  %v300_v48 = vadd.f32 %v299_v43, %v275_v40 }
  0xb7   :  { %v258_v15 = vpop.permute.xlu1 %257  ;;  %v288_v47 = vrot.slane %v287_v55, 1 }
  0xb8   :  { %v279_v20 = vmul.f32 %v449_v6, %v258_v15  ;;  %v294_v41 = vadd.f32 %v293_v34, %v292_v26 }
  0xb9   :  { %v289_v63 = vadd.f32 %v288_v47, %v287_v55 }
  0xba   :  { %v309_v23 = vadd.f32 %v308_v17, %v279_v20  ;;  %v295_v49 = vrot.slane %v294_v41, 2 }
  0xbc   :  { %v310_v31 = vadd.f32 %v309_v23, %v280_v24  ;;  %v296_v54 = vadd.f32 %v295_v49, %v294_v41 }
  0xbe   :  { %v311_v38 = vrot.slane %v310_v31, 4  ;;  %v297_v30 = vrot.slane %v296_v54, 1 }
  0xc0   :  { %v312_v45 = vadd.f32 %v311_v38, %v310_v31  ;;  %v298_v61 = vadd.f32 %v297_v30, %v296_v54 }
  0xc2   :  { %v313_v52 = vrot.slane %v312_v45, 2  ;;  %v317_v2 = vmax.f32 %v289_v63, %v298_v61 }
  0xc4   :  { %v314_v56 = vadd.f32 %v313_v52, %v312_v45 }
  0xc6   :  { %v315_v59 = vrot.slane %v314_v56, 1 }
  0xc7   :  { %v239_v46 = vpop.permute.xlu1 %238 }
  0xc8   :  { %v276_v50 = vmul.f32 %v461_v42, %v239_v46  ;;  %v316_v0 = vadd.f32 %v315_v59, %v314_v56 }
  0xca   :  { %v301_v53 = vadd.f32 %v300_v48, %v276_v50 }
  0xcc   :  { %v302_v33 = vrot.slane %v301_v53, 4 }
  0xce   :  { %v303_v57 = vadd.f32 %v302_v33, %v301_v53 }
  0xd0   :  { %v304_v58 = vrot.slane %v303_v57, 2 }
  0xd2   :  { %v305_v60 = vadd.f32 %v304_v58, %v303_v57 }
  0xd4   :  { %v306_v62 = vrot.slane %v305_v60, 1 }
  0xd6   :  { %v307_v1 = vadd.f32 %v306_v62, %v305_v60 }
  0xd8   :  { %v318_v3 = vmax.f32 %v307_v1, %v316_v0 }
  0xda   :  { %v319_v4 = vmax.f32 %v317_v2, %v318_v3 }
  0xdc   :  { %v320_v5 = vsub.f32 %v289_v63, %v319_v4  ;;  %v321_v6 = vsub.f32 %v298_v61, %v319_v4  ;;  %v322_v7 = vsub.f32 %v307_v1, %v319_v4  ;;  %v323_v8 = vsub.f32 %v316_v0, %v319_v4 }
  0xde   :  { %v324_v9 = vmul.f32 1.442695, %v320_v5  ;;  %v326_v10 = vmul.f32 1.442695, %v321_v6  ;;  %v328_v11 = vmul.f32 1.442695, %v322_v7 }
  0xdf   :  { %v330_v12 = vmul.f32 1.442695, %v323_v8 }
  0xe0   :  { %462 = vpow2.f32 %v324_v9 }
  0xe1   :  { %464 = vpow2.f32 %v326_v10 }
  0xe2   :  { %466 = vpow2.f32 %v328_v11 }
  0xe3   :  { %468 = vpow2.f32 %v330_v12 }
  0xe6   :  { %v463_v13 = vpop.eup %462 }
  0xe7   :  { %v465_v14 = vpop.eup %464 }
  0xe8   :  { %v467_v15 = vpop.eup %466  ;;  %v336_v16 = vrot.slane %v465_v14, 7 }
  0xe9   :  { %v469_v17 = vpop.eup %468  ;;  %v339_v18 = vrot.slane %v467_v15, 6 }
  0xea   :  { %v338_v19 = vsel %vm337_vm1, %v336_v16, %v463_v13  ;;  %v342_v20 = vrot.slane %v469_v17, 5 }
  0xeb   :  { %v341_v21 = vsel %vm340_vm2, %v339_v18, %v338_v19 }
  0xec   :  { %v344_v22 = vsel %vm343_vm3, %v342_v20, %v341_v21 }
  0xed   :  { %v347_v23 = vsel %vm346_vm4, %v344_v22, 0.0 }
  0xee   :  { %v348_v24 = vrot.slane %v347_v23, 4 }
  0xf0   :  { %v349_v25 = vadd.f32 %v348_v24, %v347_v23 }
  0xf2   :  { %v350_v26 = vrot.slane %v349_v25, 2 }
  0xf4   :  { %v351_v27 = vadd.f32 %v350_v26, %v349_v25 }
  0xf6   :  { %v352_v28 = vrot.slane %v351_v27, 1 }
  0xf8   :  { %v353_v29 = vadd.f32 %v352_v28, %v351_v27 }
  0xfa   :  { %470 = vrcp.f32 %v353_v29  ;;  %v365_v35 = vand.u32 2147483648, %v353_v29  ;;  %v363_v37 = vand.u32 2147483647, %v353_v29  ;;  %vm359_vm6 = vweird.f32 %v353_v29 }
  0xfc   :  { %v366_v39 = vor.u32 1.1754944e-38, %v365_v35  ;;  %vm364_vm8 = vcmp.eq.f32.partialorder %v363_v37, 8.507059e+37 }
 0x100   :  { %v471_v31 = vpop.eup %470 }
 0x101   :  { %v355_v32 = vmul.f32 %v471_v31, %v353_v29  ;;  %vm360_vm5 = vweird.f32 %v471_v31 }
 0x102   :  { %vm361_vm7 = vmor %vm359_vm6, %vm360_vm5 }
 0x103   :  { %v356_v34 = vsub.f32 1.0, %v355_v32 }
 0x105   :  { %v357_v36 = vmul.f32 %v471_v31, %v356_v34 }
 0x107   :  { %v358_v38 = vadd.f32 %v471_v31, %v357_v36 }
 0x109   :  { %v362_v40 = vsel %vm361_vm7, %v471_v31, %v358_v38 }
 0x10a   :  { %v367_v41 = vsel %vm364_vm8, %v366_v39, %v362_v40 }
 0x10b   :  { %v368_v42 = vperm.slane %v367_v41, 0 }
 0x10d   :  { %v370_v43 = vmul.f32 %v465_v14, %v368_v42  ;;  %v371_v44 = vmul.f32 %v467_v15, %v368_v42  ;;  %v372_v45 = vmul.f32 %v469_v17, %v368_v42  ;;  %v369_v46 = vmul.f32 %v463_v13, %v368_v42 }
 0x10f   :  { %v377_v48 = vrot.slane %v370_v43, 7  ;;  %v379_v49 = vrot.slane %v371_v44, 6  ;;  %v381_v51 = vrot.slane %v372_v45, 5 }
 0x111   :  { %v378_v50 = vsel %vm337_vm1, %v377_v48, %v369_v46 }
 0x112   :  { %v380_v52 = vsel %vm340_vm2, %v379_v49, %v378_v50 }
 0x113   :  { %v382_v53 = vsel %vm343_vm3, %v381_v51, %v380_v52 }
 0x114   :  { %384 = vst [vmem:[%s601_s3] sm:$0xf] %v382_v53 }

</bundles_post_ra>
